<compile_context>
chip_gen: v7x
topology: tpu7x:2x2x1
jax: 0.10.0
libtpu: 0.0.40
codegen_flags: <defaults>
</compile_context>

<pallas_src>
import numpy as np
import jax
import jax.numpy as jnp
from jax.experimental import pallas as pl
from jax.experimental.pallas import tpu as pltpu

LANE = 128      # lane-dense padded feature / class width
SUB_BF16 = 16   # bf16 sublane pack (16 rows per vreg)


def _round_up(x, m):
    return (x + m - 1) // m * m


def _vmem_capacity_bytes():
    """Per-core VMEM capacity; falls back to the smallest production value (v7x 64 MiB)."""
    try:
        info = pltpu.get_tpu_info()
        for name in ("vmem_capacity_bytes", "vmem_bytes", "vmem_size_bytes"):
            cap = getattr(info, name, None)
            if cap:
                return int(cap)
    except Exception:
        pass
    return 64 * 1024 * 1024


def _choose_b_tile(B, L_pad, E, l_out_pad, K, use_im2row, slab_bytes, aux_bytes, budget):
    """Largest multiple-of-16 batch tile whose per-step live VMEM fits the budget."""
    def live(b):
        emb_b = 2 * b * L_pad * E * 2                           # double-buffered bf16 emb
        win_b = b * l_out_pad * (K if use_im2row else E) * 2    # im2row buffer / one tap
        acc_b = 2 * b * l_out_pad * LANE * 4                    # f32 acc + masked copy
        out_b = 2 * b * LANE * 2                                # double-buffered bf16 out
        return emb_b + win_b + acc_b + out_b + slab_bytes + aux_bytes

    b = SUB_BF16
    for cand in range(512, SUB_BF16 - 1, -SUB_BF16):
        if live(cand) <= budget:
            b = cand
            break
    # keep >= 2 grid steps when the batch is big enough (v7x has 2 TensorCores/chip)
    cap = max(SUB_BF16, _round_up((B + 1) // 2, SUB_BF16))
    return max(SUB_BF16, min(b, cap))


def _make_kernel(b_tile, l_out_pad, s_max, stride, E, K, use_im2row,
                 row_lw, row_cb, row_lb):
    span = (l_out_pad - 1) * stride + 1

    def kernel(emb_ref, w_ref, aux_ref, out_ref):
        emb = emb_ref[...]                                   # (b_tile, L_pad, E) bf16
        M = b_tile * l_out_pad

        if use_im2row:
            # Small-E path: im2row so a single MXU matmul gets K = s_max*E.
            taps = [emb[:, i:i + span:stride, :] for i in range(s_max)]
            win = jnp.concatenate(taps, axis=-1)             # (b_tile, l_out_pad, K) bf16
            acc = jnp.dot(win.reshape(M, K), w_ref[0:K, :],
                          preferred_element_type=jnp.float32)
        else:
            # Large-E path: per-tap accumulation -- same FLOPs, no win buffer / concat.
            acc = jnp.dot(emb[:, 0:span:stride, :].reshape(M, E), w_ref[0:E, :],
                          preferred_element_type=jnp.float32)
            for i in range(1, s_max):
                acc += jnp.dot(emb[:, i:i + span:stride, :].reshape(M, E),
                               w_ref[i * E:(i + 1) * E, :],
                               preferred_element_type=jnp.float32)

        # Per-branch valid-length time mask (0 valid / -1e30 invalid), then max over time.
        mask = aux_ref[0:l_out_pad, :]                       # (l_out_pad, 128) f32
        pooled = jnp.max(acc.reshape(b_tile, l_out_pad, LANE) + mask[None, :, :], axis=1)

        # Bias + ReLU after the max (exact: both are monotone). Biases stay f32.
        cb = aux_ref[row_cb:row_cb + 1, :]                   # (1, 128) f32
        feats = jnp.maximum(pooled + cb, 0.0)

        # TODO(synk): nn.Dropout is identity at inference; training-mode mask not implemented.

        # Final linear into a lane-dense 128-wide bf16 logits block.
        lw = w_ref[row_lw:row_lw + LANE, :]                  # (128, 128) bf16
        lb = aux_ref[row_lb:row_lb + 1, :]                   # (1, 128) f32
        logits = jnp.dot(feats.astype(jnp.bfloat16), lw,
                         preferred_element_type=jnp.float32) + lb
        out_ref[...] = logits.astype(jnp.bfloat16)

    return kernel


def cnn_classifier_forward(token_ids, emb_table, conv_ws, conv_bs, lin_w, lin_b,
                           kernel_sizes, stride, *, b_tile=None):
    B, L = token_ids.shape
    _, E = emb_table.shape
    F = conv_ws[0].shape[-1]
    n_classes = lin_w.shape[-1]
    n_conv = len(kernel_sizes) * F
    assert n_conv <= LANE and n_classes <= LANE
    assert L >= max(kernel_sizes)

    s_max = max(kernel_sizes)
    s_min = min(kernel_sizes)
    K = s_max * E
    use_im2row = E < 128                                   # small E: fill MXU K dimension

    l_out_full = (L - s_min) // stride + 1
    l_out_pad = _round_up(l_out_full, SUB_BF16)            # bf16 sublane-packed time axis
    L_pad = max((l_out_pad - 1) * stride + s_max, L)

    # --- bf16 MXU weight slab: conv taps (tap-major rows) + linear W, 16-aligned rows --
    row_lw = _round_up(K, SUB_BF16)
    R = row_lw + LANE
    w_slab = np.zeros((R, LANE), np.float32)
    cb_row = np.zeros((LANE,), np.float32)
    for idx, (w, b, s) in enumerate(zip(conv_ws, conv_bs, kernel_sizes)):
        w_slab[:s * E, idx * F:(idx + 1) * F] = np.asarray(w, np.float32).reshape(s * E, F)
        cb_row[idx * F:(idx + 1) * F] = np.asarray(b, np.float32).reshape(-1)
    w_slab[row_lw:row_lw + n_conv, :n_classes] = np.asarray(lin_w, np.float32)

    # --- f32 aux operand: per-branch time-validity mask + conv/linear biases -----------
    valid_len = np.full((LANE,), l_out_pad, np.int32)
    for idx, s in enumerate(kernel_sizes):
        valid_len[idx * F:(idx + 1) * F] = (L - s) // stride + 1
    mask = np.where(np.arange(l_out_pad)[:, None] < valid_len[None, :],
                    0.0, -1e30).astype(np.float32)
    row_cb = l_out_pad                                     # 8-aligned (l_out_pad % 16 == 0)
    row_lb = l_out_pad + 8                                 # 8-aligned
    A = l_out_pad + 16
    aux = np.zeros((A, LANE), np.float32)
    aux[:l_out_pad] = mask
    aux[row_cb] = cb_row
    aux[row_lb, :n_classes] = np.asarray(lin_b, np.float32).reshape(-1)

    # --- per-generation tiling: size b_tile and vmem_limit against this chip's VMEM ----
    vmem_cap = _vmem_capacity_bytes()                      # 64 MiB v7x, 128 MiB v5e/v6e
    vmem_limit = min(int(vmem_cap * 0.78), 100 * 1024 * 1024)
    slab_bytes = R * LANE * 2
    aux_bytes = A * LANE * 4
    if b_tile is None:
        b_tile = _choose_b_tile(B, L_pad, E, l_out_pad, K, use_im2row,
                                slab_bytes, aux_bytes, int(vmem_limit * 0.85))
    B_pad = _round_up(B, b_tile)

    # --- embedding gather with padding folded in (single (B_pad, L_pad, E) bf16 copy) --
    ids = jnp.pad(jnp.asarray(token_ids), ((0, B_pad - B), (0, L_pad - L)))
    emb = emb_table.astype(jnp.bfloat16)[ids]              # padded rows hit vocab row 0;
    # their values never reach valid outputs (zero weight taps + -1e30 time mask + slice).
    # TODO(synk): for production vocab/seq sizes, fuse this gather into the kernel via
    # scalar-prefetched token ids + manual make_async_copy row gather from HBM so the
    # (B, L, E) activation never round-trips HBM.
    # TODO(synk): for long sequences add a second ('arbitrary', reduction-last) grid axis
    # over time with a running-max VMEM scratch so VMEM use decouples from L.

    kernel = _make_kernel(b_tile, l_out_pad, s_max, stride, E, K, use_im2row,
                          row_lw, row_cb, row_lb)

    out = pl.pallas_call(
        kernel,
        out_shape=jax.ShapeDtypeStruct((B_pad, LANE), jnp.bfloat16),
        grid=(B_pad // b_tile,),
        in_specs=[
            pl.BlockSpec((b_tile, L_pad, E), lambda i: (i, 0, 0)),  # batch-tiled emb
            pl.BlockSpec((R, LANE), lambda i: (0, 0)),              # resident bf16 weights
            pl.BlockSpec((A, LANE), lambda i: (0, 0)),              # resident f32 mask/bias
        ],
        out_specs=pl.BlockSpec((b_tile, LANE), lambda i: (i, 0)),   # lane-dense bf16 logits
        compiler_params=pltpu.CompilerParams(
            dimension_semantics=("parallel",),
            vmem_limit_bytes=int(vmem_limit),
        ),
    )(emb, jnp.asarray(w_slab, jnp.bfloat16), jnp.asarray(aux, jnp.float32))
    return out[:B, :n_classes].astype(jnp.float32)


# ----------------------------------------------------------------------------------------
# Pure-JAX f32 reference + deterministic parameter construction
# ----------------------------------------------------------------------------------------
def _reference(token_ids, emb_table, conv_ws, conv_bs, lin_w, lin_b, kernel_sizes, stride):
    B, L = token_ids.shape
    emb = emb_table[token_ids]
    feats = []
    for w, b, s in zip(conv_ws, conv_bs, kernel_sizes):
        F = w.shape[-1]
        l_out = (L - s) // stride + 1
        windows = jnp.stack(
            [emb[:, t * stride:t * stride + s, :].reshape(B, -1) for t in range(l_out)],
            axis=1)                                          # (B, l_out, s*E)
        conv = windows @ w.reshape(-1, F) + b                # (B, l_out, F)
        feats.append(jnp.max(jax.nn.relu(conv), axis=1))     # (B, F)
    return jnp.concatenate(feats, axis=1) @ lin_w + lin_b    # (B, n_classes)


def _make_params(key, V, E, kernel_sizes, num_filters, n_classes):
    n_conv = len(kernel_sizes) * num_filters
    keys = jax.random.split(key, 4 + 2 * len(kernel_sizes))
    emb_table = jax.random.normal(keys[1], (V, E), jnp.float32)
    conv_ws, conv_bs = [], []
    for i, s in enumerate(kernel_sizes):
        fan_in, fan_out = s * E, num_filters * s * E          # xavier_uniform fans
        limit = (6.0 / (fan_in + fan_out)) ** 0.5
        conv_ws.append(jax.random.uniform(
            keys[2 + 2 * i], (s, E, num_filters), jnp.float32, -limit, limit))
        conv_bs.append(jax.random.uniform(
            keys[3 + 2 * i], (1, num_filters), jnp.float32, -0.1, 0.1))
    limit = (6.0 / (n_conv + n_classes)) ** 0.5
    lin_w = jax.random.uniform(keys[-2], (n_conv, n_classes), jnp.float32, -limit, limit)
    lin_b = jax.random.uniform(keys[-1], (1, n_classes), jnp.float32, -0.1, 0.1)
    return keys[0], emb_table, conv_ws, conv_bs, lin_w, lin_b


def _run_case(key, *, B, L, V, E, F, kernel_sizes, stride, n_classes, tag):
    k_ids, emb_table, conv_ws, conv_bs, lin_w, lin_b = _make_params(
        key, V, E, kernel_sizes, F, n_classes)
    token_ids = jax.random.randint(k_ids, (B, L), 0, V)

    logits = cnn_classifier_forward(token_ids, emb_table, conv_ws, conv_bs,
                                    lin_w, lin_b, kernel_sizes, stride)
    logits = jax.block_until_ready(logits)

    ref = _reference(token_ids, emb_table, conv_ws, conv_bs, lin_w, lin_b,
                     kernel_sizes, stride)
    assert logits.shape == (B, n_classes), (tag, logits.shape)
    max_err = float(jnp.max(jnp.abs(logits - ref)))
    assert jnp.allclose(logits, ref, atol=5e-2, rtol=5e-2), (tag, max_err, logits, ref)


if __name__ == "__main__":
    root = jax.random.PRNGKey(0)
    k1, k2 = jax.random.split(root)

    # Case 1: small E -> im2row path (single MXU matmul with K = s_max*E).
    _run_case(k1, B=2, L=16, V=50, E=32, F=8,
              kernel_sizes=(2, 3, 4), stride=1, n_classes=4, tag="im2row")

    # Case 2: E = 128 -> per-tap accumulation path (no win buffer / lane concat).
    _run_case(k2, B=4, L=24, V=64, E=128, F=16,
              kernel_sizes=(2, 3, 4), stride=1, n_classes=5, tag="per_tap")

    print("KERNEL_OK")
</pallas_src>

<mosaic_0001>
module attributes {stable_mosaic.version = 11 : i64} {
  func.func @kernel(%arg0: i32, %arg1: memref<16x19x32xbf16, #tpu.memory_space<vmem>>, %arg2: memref<256x128xbf16, #tpu.memory_space<vmem>>, %arg3: memref<32x128xf32, #tpu.memory_space<vmem>>, %arg4: memref<16x128xbf16, #tpu.memory_space<vmem>>) attributes {dimension_semantics = [#tpu.dimension_semantics<parallel>], iteration_bounds = array<i64: 1>, scalar_prefetch = 0 : i64, scratch_operands = 0 : i64, tpu.core_type = #tpu.core_type<tc>, window_params = [{transform_indices = @transform_0, window_bounds = array<i64: 16, 19, 32>}, {pipeline_mode = #tpu.pipeline_mode<synchronous>, transform_indices = @transform_1, window_bounds = array<i64: 256, 128>}, {pipeline_mode = #tpu.pipeline_mode<synchronous>, transform_indices = @transform_2, window_bounds = array<i64: 32, 128>}, {transform_indices = @transform_3, window_bounds = array<i64: 16, 128>}]} {
    %c0 = arith.constant 0 : index
    %c0_0 = arith.constant 0 : index
    %c0_1 = arith.constant 0 : index
    %0 = vector.load %arg1[%c0, %c0_0, %c0_1] : memref<16x19x32xbf16, #tpu.memory_space<vmem>>, vector<16x19x32xbf16>
    %1 = vector.extract_strided_slice %0 {offsets = [0, 0, 0], sizes = [16, 16, 32], strides = [1, 1, 1]} : vector<16x19x32xbf16> to vector<16x16x32xbf16>
    %2 = vector.extract_strided_slice %0 {offsets = [0, 1, 0], sizes = [16, 16, 32], strides = [1, 1, 1]} : vector<16x19x32xbf16> to vector<16x16x32xbf16>
    %3 = vector.extract_strided_slice %0 {offsets = [0, 2, 0], sizes = [16, 16, 32], strides = [1, 1, 1]} : vector<16x19x32xbf16> to vector<16x16x32xbf16>
    %4 = vector.extract_strided_slice %0 {offsets = [0, 3, 0], sizes = [16, 16, 32], strides = [1, 1, 1]} : vector<16x19x32xbf16> to vector<16x16x32xbf16>
    %5 = tpu.concatenate %1, %2, %3, %4 in 2 : vector<16x16x32xbf16>, vector<16x16x32xbf16>, vector<16x16x32xbf16>, vector<16x16x32xbf16> -> vector<16x16x128xbf16>
    %6 = vector.shape_cast %5 : vector<16x16x128xbf16> to vector<256x128xbf16>
    %c0_2 = arith.constant 0 : index
    %c0_3 = arith.constant 0 : index
    %7 = vector.load %arg2[%c0_2, %c0_3] : memref<256x128xbf16, #tpu.memory_space<vmem>>, vector<128x128xbf16>
    %cst = arith.constant dense<0.000000e+00> : vector<256x128xf32>
    %8 = tpu.matmul %6, %7, %cst {dimension_numbers = #tpu.dot_dimension_numbers<[1], [0], [0], [1], [0, 0, 1, 1], [], []>} : vector<256x128xbf16>, vector<128x128xbf16>, vector<256x128xf32> -> vector<256x128xf32>
    %c0_4 = arith.constant 0 : index
    %c0_5 = arith.constant 0 : index
    %9 = vector.load %arg3[%c0_4, %c0_5] : memref<32x128xf32, #tpu.memory_space<vmem>>, vector<16x128xf32>
    %10 = vector.shape_cast %8 : vector<256x128xf32> to vector<16x16x128xf32>
    %11 = vector.shape_cast %9 : vector<16x128xf32> to vector<1x16x128xf32>
    %12 = vector.broadcast %11 : vector<1x16x128xf32> to vector<16x16x128xf32>
    %13 = arith.addf %10, %12 : vector<16x16x128xf32>
    %cst_6 = arith.constant dense<0xFF800000> : vector<16x128xf32>
    %14 = vector.multi_reduction <maximumf>, %13, %cst_6 [1] : vector<16x16x128xf32> to vector<16x128xf32>
    %c16 = arith.constant 16 : index
    %c0_7 = arith.constant 0 : index
    %15 = vector.load %arg3[%c16, %c0_7] : memref<32x128xf32, #tpu.memory_space<vmem>>, vector<1x128xf32>
    %16 = vector.broadcast %15 : vector<1x128xf32> to vector<16x128xf32>
    %17 = arith.addf %14, %16 : vector<16x128xf32>
    %cst_8 = arith.constant 0.000000e+00 : f32
    %18 = vector.broadcast %cst_8 : f32 to vector<16x128xf32>
    %19 = arith.maximumf %17, %18 : vector<16x128xf32>
    %c128 = arith.constant 128 : index
    %c0_9 = arith.constant 0 : index
    %20 = vector.load %arg2[%c128, %c0_9] : memref<256x128xbf16, #tpu.memory_space<vmem>>, vector<128x128xbf16>
    %c24 = arith.constant 24 : index
    %c0_10 = arith.constant 0 : index
    %21 = vector.load %arg3[%c24, %c0_10] : memref<32x128xf32, #tpu.memory_space<vmem>>, vector<1x128xf32>
    %22 = arith.truncf %19 : vector<16x128xf32> to vector<16x128xbf16>
    %cst_11 = arith.constant dense<0.000000e+00> : vector<16x128xf32>
    %23 = tpu.matmul %22, %20, %cst_11 {dimension_numbers = #tpu.dot_dimension_numbers<[1], [0], [0], [1], [0, 0, 1, 1], [], []>} : vector<16x128xbf16>, vector<128x128xbf16>, vector<16x128xf32> -> vector<16x128xf32>
    %24 = vector.broadcast %21 : vector<1x128xf32> to vector<16x128xf32>
    %25 = arith.addf %23, %24 : vector<16x128xf32>
    %26 = arith.truncf %25 : vector<16x128xf32> to vector<16x128xbf16>
    %c0_12 = arith.constant 0 : index
    %c0_13 = arith.constant 0 : index
    %27 = vector.load %arg4[%c0_12, %c0_13] : memref<16x128xbf16, #tpu.memory_space<vmem>>, vector<16x128xbf16>
    tpu.vector_store %arg4[%c0_12, %c0_13], %26 {strides = array<i32>} : memref<16x128xbf16, #tpu.memory_space<vmem>>, vector<16x128xbf16>,
    return
  }
  func.func @transform_0(%arg0: i32) -> (i32, i32, i32) {
    %c0_i32 = arith.constant 0 : i32
    %c0_i32_0 = arith.constant 0 : i32
    %c0_i32_1 = arith.constant 0 : i32
    return %arg0, %c0_i32, %c0_i32_0 : i32, i32, i32
  }
  func.func @transform_1(%arg0: i32) -> (i32, i32) {
    %c0_i32 = arith.constant 0 : i32
    %c0_i32_0 = arith.constant 0 : i32
    %c0_i32_1 = arith.constant 0 : i32
    return %c0_i32, %c0_i32_0 : i32, i32
  }
  func.func @transform_2(%arg0: i32) -> (i32, i32) {
    %c0_i32 = arith.constant 0 : i32
    %c0_i32_0 = arith.constant 0 : i32
    %c0_i32_1 = arith.constant 0 : i32
    return %c0_i32, %c0_i32_0 : i32, i32
  }
  func.func @transform_3(%arg0: i32) -> (i32, i32) {
    %c0_i32 = arith.constant 0 : i32
    %c0_i32_0 = arith.constant 0 : i32
    return %arg0, %c0_i32 : i32, i32
  }
}

</mosaic_0001>

<bundles_post_ra>
// kernel: tpu_custom_call.1
= control target key start
LH: loop header
LB: loop body
LE: loop exit
PB: predicated region body
PF: predicated region fallthrough
CT: control target
= control target key end

     0   :  { %vm417_vm0 = vcmask 1046528   ;;  %vm192_vm1 = vsmask.f32 7424  ;;  %s1658_s20 = smov 64   ;;  %vm498_vm2 = vsmask.f32 6400  ;;  %s2201_s0 = inlined_call_operand.vmem [shape: bf16[16,19,32], index: 0, kind: input, shape index: {}]   ;;  %s2202_s1 = inlined_call_operand.vmem [shape: bf16[256,128], index: 1, kind: input, shape index: {}]   ;;  %s2203_s2 = inlined_call_operand.vmem [shape: f32[32,128], index: 2, kind: input, shape index: {}]   ;;  %s2204_s3 = inlined_call_operand.hbm [shape: bf16[16,128], index: 3, kind: output, shape index: {}]  }
   0x1   :  { %v1688_v0 = vld [vmem:[%s2201_s0] sm:$0xff]   ;;  %v1587_v1 = vld [vmem:[%s2201_s0 + $0x8] ss:$0 sps:$4 sm:$0x33]   ;;  %v1697_v4 = vld [vmem:[%s2201_s0 + $0xc] sm:$0xff]   ;;  %s1659_s27 = smov 32  }
   0x2   :  { %v418_v2 = vrot.slane %v1688_v0, 1  ;;  %v419_v3 = vrot.slane %v1587_v1, 1  ;;  %v1589_v5 = vld [vmem:[%s2201_s0 + $0x14] ss:$0 sps:$4 sm:$0x33]   ;;  %v194_v6 = vshrl.u32 %v1688_v0, 16 }
   0x3   :  { %v196_v7 = vshll.u32 %v1688_v0, 16  ;;  %v201_v8 = vshll.u32 %v1587_v1, 16  ;;  %v421_v10 = vrot.slane %v1697_v4, 1  ;;  %v422_v11 = vrot.slane %v1589_v5, 1  ;;  %v1713_v24 = vld [vmem:[%s2201_s0 + $0x24] sm:$0xff]   ;;  %v1724_v33 = vld [vmem:[%s2201_s0 + $0x18] sm:$0xff]  }
   0x4   :  { %v420_v9 = vsel %vm417_vm0, %v418_v2, %v419_v3  ;;  %v206_v12 = vshrl.u32 %v1697_v4, 16  ;;  %v208_v15 = vshll.u32 %v1697_v4, 16  ;;  %v213_v16 = vshll.u32 %v1589_v5, 16  ;;  %v1591_v27 = vld [vmem:[%s2201_s0 + $0x2c] ss:$0 sps:$4 sm:$0x33]  }
   0x5   :  { %466 = vrot.lane.b32.xlu1 %v420_v9, %s1658_s20  ;;  %v198_v13 = vrot.slane %v196_v7, 1  ;;  %v203_v14 = vrot.slane %v201_v8, 1  ;;  %v423_v17 = vsel %vm417_vm0, %v421_v10, %v422_v11  ;;  %v511_v19 = vshrl.u32 %v1589_v5, 16  ;;  %v1593_v38 = vld [vmem:[%s2201_s0 + $0x20] ss:$0 sps:$4 sm:$0x33]  }
   0x6   :  { %v508_v18 = vrot.slane %v206_v12, 1  ;;  %v509_v21 = vrot.slane %v208_v15, 2  ;;  %v514_v22 = vrot.slane %v213_v16, 2  ;;  %v210_v23 = vrot.slane %v208_v15, 1  ;;  %v1737_v47 = vld [vmem:[%s2201_s0 + $0x3c] sm:$0xff]   ;;  %s1660_s5 = smov 96  }
   0x7   :  { %v199_v20 = vor.u32 %v198_v13, %v194_v6  ;;  %v513_v25 = vrot.slane %v511_v19, 1  ;;  %v215_v26 = vrot.slane %v213_v16, 1  ;;  %v499_v28 = vrot.slane %v194_v6, 1  ;;  %v1595_v56 = vld [vmem:[%s2201_s0 + $0x44] ss:$0 sps:$4 sm:$0x33]  }
   0x8   :  { %v510_v30 = vor.u32 %v509_v21, %v508_v18  ;;  %v211_v31 = vor.u32 %v210_v23, %v206_v12  ;;  %v230_v32 = vshrl.u32 %v1713_v24, 16  ;;  %v232_v35 = vshll.u32 %v1713_v24, 16  ;;  %v1758_v15 = vld [vmem:[%s2201_s0 + $0x30] sm:$0xff]   ;;  %v1597_v16 = vld [vmem:[%s2201_s0 + $0x38] ss:$0 sps:$4 sm:$0x33]  }
   0x9   :  { %468 = vrot.lane.b32.xlu1 %v423_v17, %s1658_s20  ;;  %v204_v29 = vsel %vm192_vm1, %v199_v20, %v203_v14  ;;  %v515_v34 = vor.u32 %v514_v22, %v513_v25  ;;  %v237_v36 = vshll.u32 %v1591_v27, 16  ;;  %v500_v37 = vrot.slane %v196_v7, 2 }
   0xa   :  { %385 = vrot.lane.b32.xlu0 %v204_v29, %s1659_s27  ;;  %v216_v39 = vsel %vm192_vm1, %v211_v31, %v215_v26  ;;  %v502_v40 = vshrl.u32 %v1587_v1, 16  ;;  %v505_v41 = vrot.slane %v201_v8, 2  ;;  %v427_v42 = vrot.slane %v1713_v24, 1 }
   0xb   :  { %v516_v43 = vsel %vm498_vm2, %v510_v30, %v515_v34  ;;  %v234_v44 = vrot.slane %v232_v35, 1  ;;  %v239_v45 = vrot.slane %v237_v36, 1  ;;  %v501_v46 = vor.u32 %v500_v37, %v499_v28 }
   0xc   :  { %v504_v48 = vrot.slane %v502_v40, 1  ;;  %v428_v49 = vrot.slane %v1591_v27, 1  ;;  %v218_v50 = vshrl.u32 %v1724_v33, 16  ;;  %v220_v51 = vshll.u32 %v1724_v33, 16 }
   0xd   :  { %645 = vrot.lane.b32.xlu1 %v516_v43, %s1660_s5  ;;  %v235_v52 = vor.u32 %v234_v44, %v230_v32  ;;  %v225_v53 = vshll.u32 %v1593_v38, 16  ;;  %v526_v54 = vrot.slane %v230_v32, 1  ;;  %v527_v55 = vrot.slane %v232_v35, 2 }
   0xe   :  { %387 = vrot.lane.b32.xlu0 %v216_v39, %s1659_s27  ;;  %v506_v57 = vor.u32 %v505_v41, %v504_v48  ;;  %v429_v58 = vsel %vm417_vm0, %v427_v42, %v428_v49  ;;  %v222_v59 = vrot.slane %v220_v51, 1  ;;  %v529_v60 = vshrl.u32 %v1591_v27, 16  ;;  %v1770_v27 = vld [vmem:[%s2201_s0 + $0x54] sm:$0xff]   ;;  %v1788_v48 = vld [vmem:[%s2201_s0 + $0x48] sm:$0xff]  }
   0xf   :  { %v240_v61 = vsel %vm192_vm1, %v235_v52, %v239_v45  ;;  %v227_v62 = vrot.slane %v225_v53, 1  ;;  %v528_v63 = vor.u32 %v527_v55, %v526_v54  ;;  %v532_v1 = vrot.slane %v237_v36, 2 }
  0x10   :  { %v507_v2 = vsel %vm498_vm2, %v501_v46, %v506_v57  ;;  %v223_v3 = vor.u32 %v222_v59, %v218_v50  ;;  %v531_v5 = vrot.slane %v529_v60, 1  ;;  %v424_v6 = vrot.slane %v1724_v33, 1 }
  0x11   :  { %391 = vrot.lane.b32.xlu1 %v240_v61, %s1659_s27  ;;  %v425_v7 = vrot.slane %v1593_v38, 1  ;;  %v254_v8 = vshrl.u32 %v1737_v47, 16  ;;  %v256_v9 = vshll.u32 %v1737_v47, 16  ;;  %v261_v10 = vshll.u32 %v1595_v56, 16 }
  0x12   :  { %643 = vrot.lane.b32.xlu0 %v507_v2, %s1660_s5  ;;  %v228_v11 = vsel %vm192_vm1, %v223_v3, %v227_v62  ;;  %v533_v12 = vor.u32 %v532_v1, %v531_v5  ;;  %v517_v13 = vrot.slane %v218_v50, 1  ;;  %v518_v14 = vrot.slane %v220_v51, 2 }
  0x13   :  { %v258_v17 = vrot.slane %v256_v9, 1  ;;  %v520_v18 = vshrl.u32 %v1593_v38, 16  ;;  %v426_v19 = vsel %vm417_vm0, %v424_v6, %v425_v7  ;;  %v263_v20 = vrot.slane %v261_v10, 1  ;;  %v1779_v38 = vld [vmem:[%s2201_s0 + $0x5c] ss:$0 sps:$4 sm:$0x33]  }
  0x14   :  { %v523_v21 = vrot.slane %v225_v53, 2  ;;  %v534_v22 = vsel %vm498_vm2, %v528_v63, %v533_v12  ;;  %v519_v25 = vor.u32 %v518_v14, %v517_v13  ;;  %v433_v28 = vrot.slane %v1737_v47, 1  ;;  %v1601_v63 = vld [vmem:[%s2201_s0 + $0x50] ss:$0 sps:$4 sm:$0x33]  }
  0x15   :  { %472 = vrot.lane.b32.xlu1 %v429_v58, %s1658_s20  ;;  %v259_v23 = vor.u32 %v258_v17, %v254_v8  ;;  %v522_v26 = vrot.slane %v520_v18, 1  ;;  %v242_v29 = vshrl.u32 %v1758_v15, 16  ;;  %v244_v30 = vshll.u32 %v1758_v15, 16  ;;  %v1815_v14 = vld [vmem:[%s2201_s0 + $0x74] ss:$0 sps:$4 sm:$0x33]  }
  0x16   :  { %389 = vrot.lane.b32.xlu0 %v228_v11, %s1659_s27  ;;  %v249_v31 = vshll.u32 %v1597_v16, 16  ;;  %v434_v34 = vrot.slane %v1595_v56, 1  ;;  %v547_v35 = vshrl.u32 %v1595_v56, 16  ;;  %v544_v37 = vrot.slane %v254_v8, 1 }
  0x17   :  { %v524_v32 = vor.u32 %v523_v21, %v522_v26  ;;  %v246_v36 = vrot.slane %v244_v30, 1  ;;  %v264_v39 = vsel %vm192_vm1, %v259_v23, %v263_v20  ;;  %v545_v40 = vrot.slane %v256_v9, 2  ;;  %v1809_v9 = vld [vmem:[%s2201_s0 + $0x6c] sm:$0xff]  }
  0x18   :  { %v549_v41 = vrot.slane %v547_v35, 1  ;;  %v550_v42 = vrot.slane %v261_v10, 2  ;;  %v251_v45 = vrot.slane %v249_v31, 1  ;;  %v280_v46 = vshll.u32 %v1770_v27, 16 }
  0x19   :  { %649 = vrot.lane.b32.xlu1 %v534_v22, %s1660_s5  ;;  %v525_v43 = vsel %vm498_vm2, %v519_v25, %v524_v32  ;;  %v247_v44 = vor.u32 %v246_v36, %v242_v29  ;;  %v435_v49 = vsel %vm417_vm0, %v433_v28, %v434_v34  ;;  %v430_v50 = vrot.slane %v1758_v15, 1  ;;  %v1826_v25 = vld [vmem:[%s2201_s0 + $0x60] sm:$0xff]   ;;  %v1833_v35 = vld [vmem:[%s2201_s0 + $0x68] ss:$0 sps:$4 sm:$0x33]  }
  0x1a   :  { %470 = vrot.lane.b32.xlu0 %v426_v19, %s1658_s20  ;;  %v431_v51 = vrot.slane %v1597_v16, 1  ;;  %v278_v52 = vshrl.u32 %v1770_v27, 16  ;;  %v285_v53 = vshll.u32 %v1779_v38, 16  ;;  %v535_v54 = vrot.slane %v242_v29, 1 }
  0x1b   :  { %v538_v55 = vshrl.u32 %v1597_v16, 16  ;;  %v546_v56 = vor.u32 %v545_v40, %v544_v37  ;;  %v551_v57 = vor.u32 %v550_v42, %v549_v41  ;;  %v282_v58 = vrot.slane %v280_v46, 1 }
  0x1c   :  { %v536_v59 = vrot.slane %v244_v30, 2  ;;  %v252_v60 = vsel %vm192_vm1, %v247_v44, %v251_v45  ;;  %v541_v62 = vrot.slane %v249_v31, 2  ;;  %v268_v1 = vshll.u32 %v1788_v48, 16 }
  0x1d   :  { %395 = vrot.lane.b32.xlu1 %v264_v39, %s1659_s27  ;;  %v540_v61 = vrot.slane %v538_v55, 1  ;;  %v432_v2 = vsel %vm417_vm0, %v430_v50, %v431_v51  ;;  %v565_v3 = vshrl.u32 %v1779_v38, 16  ;;  %v552_v5 = vsel %vm498_vm2, %v546_v56, %v551_v57 }
  0x1e   :  { %647 = vrot.lane.b32.xlu0 %v525_v43, %s1660_s5  ;;  %v283_v6 = vor.u32 %v282_v58, %v278_v52  ;;  %v287_v7 = vrot.slane %v285_v53, 1  ;;  %v537_v8 = vor.u32 %v536_v59, %v535_v54  ;;  %v266_v11 = vshrl.u32 %v1788_v48, 16  ;;  %v1618_v54 = vld [vmem:[%s2202_s1] sm:$0xff]  }
  0x1f   :  { %v542_v10 = vor.u32 %v541_v62, %v540_v61  ;;  %v270_v12 = vrot.slane %v268_v1, 1  ;;  %v273_v13 = vshll.u32 %v1601_v63, 16  ;;  %v562_v16 = vrot.slane %v278_v52, 1  ;;  %1511 = vmatprep.subr.bf16.mxu0 %v1618_v54 }
  0x20   :  { %v563_v17 = vrot.slane %v280_v46, 2  ;;  %v567_v18 = vrot.slane %v565_v3, 1  ;;  %v568_v19 = vrot.slane %v285_v53, 2  ;;  %v288_v20 = vsel %vm192_vm1, %v283_v6, %v287_v7  ;;  %v1849_v53 = vld [vmem:[%s2201_s0 + $0x84] sm:$0xff]   ;;  %1512 = vmatpush3.bf16.msra.mxu0 %v1618_v54 }
  0x21   :  { %476 = vrot.lane.b32.xlu1 %v435_v49, %s1658_s20  ;;  %v439_v21 = vrot.slane %v1770_v27, 1  ;;  %v440_v22 = vrot.slane %v1779_v38, 1  ;;  %v304_v23 = vshll.u32 %v1809_v9, 16  ;;  %v543_v26 = vsel %vm498_vm2, %v537_v8, %v542_v10  ;;  %v1619_v6 = vld [vmem:[%s2202_s1 + $0x8] sm:$0xff]  }
  0x22   :  { %393 = vrot.lane.b32.xlu0 %v252_v60, %s1659_s27  ;;  %v271_v28 = vor.u32 %v270_v12, %v266_v11  ;;  %v275_v29 = vrot.slane %v273_v13, 1  ;;  %v556_v30 = vshrl.u32 %v1601_v63, 16  ;;  %v564_v31 = vor.u32 %v563_v17, %v562_v16  ;;  %1513 = vmatprep.subr.bf16.mxu0 %v1619_v6  ;;  %v1620_v16 = vld [vmem:[%s2202_s1 + $0x10] sm:$0xff]  }
  0x23   :  { %v436_v32 = vrot.slane %v1788_v48, 1  ;;  %v437_v34 = vrot.slane %v1601_v63, 1  ;;  %v569_v36 = vor.u32 %v568_v19, %v567_v18  ;;  %v302_v37 = vshrl.u32 %v1809_v9, 16  ;;  %v1862_v63 = vld [vmem:[%s2201_s0 + $0x8c] ss:$0 sps:$4 sm:$0x33]  }
  0x24   :  { %v309_v38 = vshll.u32 %v1815_v14, 16  ;;  %v553_v39 = vrot.slane %v266_v11, 1  ;;  %v441_v40 = vsel %vm417_vm0, %v439_v21, %v440_v22  ;;  %v306_v41 = vrot.slane %v304_v23, 1  ;;  %v1874_v11 = vld [vmem:[%s2201_s0 + $0x78] sm:$0xff]   ;;  %1514 = vmatpush3.bf16.msra.mxu0 %v1619_v6 }
  0x25   :  { %653 = vrot.lane.b32.xlu1 %v552_v5, %s1660_s5  ;;  %v554_v42 = vrot.slane %v268_v1, 2  ;;  %v276_v43 = vsel %vm192_vm1, %v271_v28, %v275_v29  ;;  %v558_v44 = vrot.slane %v556_v30, 1  ;;  %v559_v45 = vrot.slane %v273_v13, 2  ;;  %1515 = vmatprep.subr.bf16.mxu0 %v1620_v16  ;;  %v1621_v28 = vld [vmem:[%s2202_s1 + $0x18] sm:$0xff]  }
  0x26   :  { %474 = vrot.lane.b32.xlu0 %v432_v2, %s1658_s20  ;;  %v292_v46 = vshll.u32 %v1826_v25, 16  ;;  %v570_v49 = vsel %vm498_vm2, %v564_v31, %v569_v36  ;;  %v438_v50 = vsel %vm417_vm0, %v436_v32, %v437_v34  ;;  %v311_v51 = vrot.slane %v309_v38, 1 }
  0x27   :  { %v583_v52 = vshrl.u32 %v1815_v14, 16  ;;  %v307_v55 = vor.u32 %v306_v41, %v302_v37  ;;  %v555_v56 = vor.u32 %v554_v42, %v553_v39  ;;  %v445_v57 = vrot.slane %v1809_v9, 1  ;;  %v1622_v39 = vld [vmem:[%s2202_s1 + $0x20] sm:$0xff]  }
  0x28   :  { %v297_v58 = vshll.u32 %v1833_v35, 16  ;;  %v560_v59 = vor.u32 %v559_v45, %v558_v44  ;;  %v446_v60 = vrot.slane %v1815_v14, 1  ;;  %v290_v61 = vshrl.u32 %v1826_v25, 16  ;;  %1516 = vmatpush3.bf16.msra.mxu0 %v1620_v16  ;;  %v1909_v44 = vld [vmem:[%s2201_s0 + $0x9c] sm:$0xff]  }
  0x29   :  { %399 = vrot.lane.b32.xlu1 %v288_v20, %s1659_s27  ;;  %v294_v62 = vrot.slane %v292_v46, 1  ;;  %v580_v1 = vrot.slane %v302_v37, 1  ;;  %v581_v2 = vrot.slane %v304_v23, 2  ;;  %v585_v3 = vrot.slane %v583_v52, 1  ;;  %1517 = vmatprep.subr.bf16.mxu0 %v1621_v28 }
  0x2a   :  { %651 = vrot.lane.b32.xlu0 %v543_v26, %s1660_s5  ;;  %v586_v5 = vrot.slane %v309_v38, 2  ;;  %v312_v7 = vsel %vm192_vm1, %v307_v55, %v311_v51  ;;  %v299_v8 = vrot.slane %v297_v58, 1  ;;  %v328_v10 = vshll.u32 %v1849_v53, 16  ;;  %v1890_v26 = vld [vmem:[%s2201_s0 + $0x80] ss:$0 sps:$4 sm:$0x33]  }
  0x2b   :  { %v561_v12 = vsel %vm498_vm2, %v555_v56, %v560_v59  ;;  %v295_v13 = vor.u32 %v294_v62, %v290_v61  ;;  %v574_v14 = vshrl.u32 %v1833_v35, 16  ;;  %v447_v17 = vsel %vm417_vm0, %v445_v57, %v446_v60  ;;  %v1916_v51 = vld [vmem:[%s2201_s0 + $0xa4] ss:$0 sps:$4 sm:$0x33]   ;;  %v1623_v57 = vld [vmem:[%s2202_s1 + $0x28] sm:$0xff]  }
  0x2c   :  { %v582_v18 = vor.u32 %v581_v2, %v580_v1  ;;  %v442_v19 = vrot.slane %v1826_v25, 1  ;;  %v587_v20 = vor.u32 %v586_v5, %v585_v3  ;;  %v443_v21 = vrot.slane %v1833_v35, 1  ;;  %1518 = vmatpush3.bf16.msra.mxu0 %v1621_v28  ;;  %v1932_v3 = vld [vmem:[%s2201_s0 + $0x90] sm:$0xff]  }
  0x2d   :  { %480 = vrot.lane.b32.xlu1 %v441_v40, %s1658_s20  ;;  %v326_v22 = vshrl.u32 %v1849_v53, 16  ;;  %v333_v23 = vshll.u32 %v1862_v63, 16  ;;  %v330_v29 = vrot.slane %v328_v10, 1  ;;  %v571_v30 = vrot.slane %v290_v61, 1  ;;  %1519 = vmatprep.subr.bf16.mxu0 %v1622_v39 }
  0x2e   :  { %397 = vrot.lane.b32.xlu0 %v276_v43, %s1659_s27  ;;  %v572_v31 = vrot.slane %v292_v46, 2  ;;  %v577_v32 = vrot.slane %v297_v58, 2  ;;  %v300_v34 = vsel %vm192_vm1, %v295_v13, %v299_v8  ;;  %v576_v35 = vrot.slane %v574_v14, 1  ;;  %v1943_v13 = vld [vmem:[%s2201_s0 + $0x98] ss:$0 sps:$4 sm:$0x33]  }
  0x2f   :  { %v316_v36 = vshll.u32 %v1874_v11, 16  ;;  %v444_v37 = vsel %vm417_vm0, %v442_v19, %v443_v21  ;;  %v335_v38 = vrot.slane %v333_v23, 1  ;;  %v588_v40 = vsel %vm498_vm2, %v582_v18, %v587_v20  ;;  %v1624_v14 = vld [vmem:[%s2202_s1 + $0x30] sm:$0xff]  }
  0x30   :  { %v331_v41 = vor.u32 %v330_v29, %v326_v22  ;;  %v573_v42 = vor.u32 %v572_v31, %v571_v30  ;;  %v601_v43 = vshrl.u32 %v1862_v63, 16  ;;  %v578_v45 = vor.u32 %v577_v32, %v576_v35  ;;  %1520 = vmatpush3.bf16.msra.mxu0 %v1622_v39  ;;  %v1625_v29 = vld [vmem:[%s2202_s1 + $0x38] sm:$0xff]  }
  0x31   :  { %657 = vrot.lane.b32.xlu1 %v570_v49, %s1660_s5  ;;  %v314_v46 = vshrl.u32 %v1874_v11, 16  ;;  %v318_v49 = vrot.slane %v316_v36, 1  ;;  %v451_v52 = vrot.slane %v1849_v53, 1  ;;  %v452_v54 = vrot.slane %v1862_v63, 1  ;;  %1521 = vmatprep.subr.bf16.mxu0 %v1623_v57  ;;  %v1962_v35 = vld [vmem:[%s2201_s0 + $0xb4] sm:$0xff]  }
  0x32   :  { %478 = vrot.lane.b32.xlu0 %v438_v50, %s1658_s20  ;;  %v321_v50 = vshll.u32 %v1890_v26, 16  ;;  %v598_v55 = vrot.slane %v326_v22, 1  ;;  %v599_v56 = vrot.slane %v328_v10, 2  ;;  %v336_v58 = vsel %vm192_vm1, %v331_v41, %v335_v38 }
  0x33   :  { %v603_v59 = vrot.slane %v601_v43, 1  ;;  %v604_v60 = vrot.slane %v333_v23, 2  ;;  %v352_v61 = vshll.u32 %v1909_v44, 16  ;;  %v579_v62 = vsel %vm498_vm2, %v573_v42, %v578_v45 }
  0x34   :  { %v319_v1 = vor.u32 %v318_v49, %v314_v46  ;;  %v323_v2 = vrot.slane %v321_v50, 1  ;;  %v592_v63 = vshrl.u32 %v1890_v26, 16  ;;  %v448_v5 = vrot.slane %v1874_v11, 1  ;;  %1522 = vmatpush3.bf16.msra.mxu0 %v1623_v57 }
  0x35   :  { %403 = vrot.lane.b32.xlu1 %v312_v7, %s1659_s27  ;;  %v449_v6 = vrot.slane %v1890_v26, 1  ;;  %v453_v7 = vsel %vm417_vm0, %v451_v52, %v452_v54  ;;  %v350_v8 = vshrl.u32 %v1909_v44, 16  ;;  %v357_v10 = vshll.u32 %v1916_v51, 16  ;;  %1523 = vmatprep.subr.bf16.mxu0 %v1624_v14 }
  0x36   :  { %655 = vrot.lane.b32.xlu0 %v561_v12, %s1660_s5  ;;  %v589_v12 = vrot.slane %v314_v46, 1  ;;  %v600_v16 = vor.u32 %v599_v56, %v598_v55  ;;  %v354_v18 = vrot.slane %v352_v61, 1  ;;  %v590_v19 = vrot.slane %v316_v36, 2 }
  0x37   :  { %v324_v20 = vsel %vm192_vm1, %v319_v1, %v323_v2  ;;  %v594_v21 = vrot.slane %v592_v63, 1  ;;  %v595_v22 = vrot.slane %v321_v50, 2  ;;  %v340_v23 = vshll.u32 %v1932_v3, 16 }
  0x38   :  { %v450_v26 = vsel %vm417_vm0, %v448_v5, %v449_v6  ;;  %v359_v28 = vrot.slane %v357_v10, 1  ;;  %v355_v31 = vor.u32 %v354_v18, %v350_v8  ;;  %v591_v32 = vor.u32 %v590_v19, %v589_v12 }
  0x39   :  { %484 = vrot.lane.b32.xlu1 %v447_v17, %s1658_s20  ;;  %v605_v17 = vor.u32 %v604_v60, %v603_v59  ;;  %v596_v36 = vor.u32 %v595_v22, %v594_v21  ;;  %v342_v38 = vrot.slane %v340_v23, 1  ;;  %v345_v39 = vshll.u32 %v1943_v13, 16 }
  0x3a   :  { %401 = vrot.lane.b32.xlu0 %v300_v34, %s1659_s27  ;;  %v619_v34 = vshrl.u32 %v1916_v51, 16 }
  0x3b   :  { %v606_v30 = vsel %vm498_vm2, %v600_v16, %v605_v17 }
  0x3d   :  { %661 = vrot.lane.b32.xlu1 %v588_v40, %s1660_s5 }
  0x3e   :  { %482 = vrot.lane.b32.xlu0 %v444_v37, %s1658_s20  ;;  %v338_v37 = vshrl.u32 %v1932_v3, 16 }
  0x41   :  { %407 = vrot.lane.b32.xlu1 %v336_v58, %s1659_s27 }
  0x42   :  { %659 = vrot.lane.b32.xlu0 %v579_v62, %s1660_s5 }
  0x45   :  { %488 = vrot.lane.b32.xlu1 %v453_v7, %s1658_s20 }
  0x46   :  { %405 = vrot.lane.b32.xlu0 %v324_v20, %s1659_s27 }
  0x47   :  { %8 = vsyncpa [#allocation3], 0  ;;  %v457_v40 = vrot.slane %v1909_v44, 1  ;;  %v458_v41 = vrot.slane %v1916_v51, 1  ;;  %v616_v42 = vrot.slane %v350_v8, 1  ;;  %v617_v43 = vrot.slane %v352_v61, 2  ;;  %1524 = vmatpush3.bf16.msra.mxu0 %v1624_v14 }
  0x48   :  { %v1615_v45 = vld [vmem:[%s2201_s0 + $0xbc] ss:$0 sps:$4 sm:$0x33]   ;;  %1525 = vmatprep.subr.bf16.mxu0 %v1625_v29  ;;  %v360_v46 = vsel %vm192_vm1, %v355_v31, %v359_v28  ;;  %v621_v49 = vrot.slane %v619_v34, 1  ;;  %v622_v50 = vrot.slane %v357_v10, 2  ;;  %v376_v52 = vshll.u32 %v1962_v35, 16 }
  0x49   :  { %665 = vrot.lane.b32.xlu1 %v606_v30, %s1660_s5  ;;  %v597_v51 = vsel %vm498_vm2, %v591_v32, %v596_v36  ;;  %v343_v54 = vor.u32 %v342_v38, %v338_v37  ;;  %v347_v55 = vrot.slane %v345_v39, 1  ;;  %v610_v56 = vshrl.u32 %v1943_v13, 16  ;;  %v1980_v57 = vld [vmem:[%s2201_s0 + $0xa8] sm:$0xff]   ;;  %v1617_v12 = vld [vmem:[%s2201_s0 + $0xb0] ss:$0 sps:$4 sm:$0x33]  }
  0x4a   :  { %486 = vrot.lane.b32.xlu0 %v450_v26, %s1658_s20  ;;  %v459_v58 = vsel %vm417_vm0, %v457_v40, %v458_v41  ;;  %v618_v59 = vor.u32 %v617_v43, %v616_v42  ;;  %v454_v60 = vrot.slane %v1932_v3, 1  ;;  %v455_v61 = vrot.slane %v1943_v13, 1  ;;  %s1663_s16 = smov [#allocation2]  }
  0x4b   :  { %1526 = vmatpush3.bf16.msra.mxu0 %v1625_v29  ;;  %v374_v62 = vshrl.u32 %v1962_v35, 16  ;;  %v381_v1 = vshll.u32 %v1615_v45, 16  ;;  %v623_v2 = vor.u32 %v622_v50, %v621_v49  ;;  %v378_v63 = vrot.slane %v376_v52, 1  ;;  %s1408_s17 = sshll.u32 %s1663_s16, 4  ;;  %s1409_s17 = int_to_ptr.vmem [resolvable:$true] %s1408_s17 }
  0x4c   :  { %v607_v5 = vrot.slane %v338_v37, 1  ;;  %v608_v6 = vrot.slane %v340_v23, 2  ;;  %v348_v7 = vsel %vm192_vm1, %v343_v54, %v347_v55  ;;  %v612_v8 = vrot.slane %v610_v56, 1  ;;  %s1634_s18 = scalar_lea.vmem %s1409_s17, 128  ;;  %p1639_p1 = scmp.lt.s32.totalorder %s1409_s17, %s1409_s17 }
  0x4d   :  { %411 = vrot.lane.b32.xlu1 %v360_v46, %s1659_s27  ;;  %v613_v10 = vrot.slane %v345_v39, 2  ;;  %v364_v14 = vshll.u32 %v1980_v57, 16  ;;  %v456_v13 = vsel %vm417_vm0, %v454_v60, %v455_v61  ;;  %v383_v16 = vrot.slane %v381_v1, 1  ;;  %p1635_p0 = scmp.ne.s32.totalorder %s1409_s17, %s1634_s18  ;;  %p1640_p2 = scmp.lt.s32.totalorder %s1634_s18, %s1634_s18 }
  0x4e   :  { %663 = vrot.lane.b32.xlu0 %v597_v51, %s1660_s5  ;;  %v624_v17 = vsel %vm498_vm2, %v618_v59, %v623_v2  ;;  %v379_v18 = vor.u32 %v378_v63, %v374_v62  ;;  %v609_v19 = vor.u32 %v608_v6, %v607_v5  ;;  %v637_v20 = vshrl.u32 %v1615_v45, 16 }
  0x4f   :  { %v614_v21 = vor.u32 %v613_v10, %v612_v8  ;;  %v362_v22 = vshrl.u32 %v1980_v57, 16  ;;  %v366_v23 = vrot.slane %v364_v14, 1  ;;  %v369_v26 = vshll.u32 %v1617_v12, 16  ;;  %p1641_p3 = por %p1640_p2, %p1639_p1 }
  0x50   :  { %v463_v28 = vrot.slane %v1962_v35, 1  ;;  %v464_v29 = vrot.slane %v1615_v45, 1  ;;  %v634_v30 = vrot.slane %v374_v62, 1  ;;  %v635_v31 = vrot.slane %v376_v52, 2 }
  0x51   :  { %492 = vrot.lane.b32.xlu1 %v459_v58, %s1658_s20  ;;  %v384_v32 = vsel %vm192_vm1, %v379_v18, %v383_v16  ;;  %v639_v34 = vrot.slane %v637_v20, 1  ;;  %v640_v36 = vrot.slane %v381_v1, 2  ;;  %v615_v37 = vsel %vm498_vm2, %v609_v19, %v614_v21  ;;  %p1642_p4 = pnand %p1641_p3, %p1635_p0 }
  0x52   :  { %409 = vrot.lane.b32.xlu0 %v348_v7, %s1659_s27  ;;  %v367_v38 = vor.u32 %v366_v23, %v362_v22  ;;  %v371_v39 = vrot.slane %v369_v26, 1  ;;  %v628_v40 = vshrl.u32 %v1617_v12, 16  ;;  %v465_v41 = vsel %vm417_vm0, %v463_v28, %v464_v29 }
  0x53   :  { %v636_v42 = vor.u32 %v635_v31, %v634_v30  ;;  %v641_v43 = vor.u32 %v640_v36, %v639_v34  ;;  %v460_v45 = vrot.slane %v1980_v57, 1  ;;  %v461_v46 = vrot.slane %v1617_v12, 1 }
  0x54   :  { %v625_v49 = vrot.slane %v362_v22, 1  ;;  %v372_v50 = vsel %vm192_vm1, %v367_v38, %v371_v39  ;;  %v626_v52 = vrot.slane %v364_v14, 2  ;;  %v630_v51 = vrot.slane %v628_v40, 1 }
  0x55   :  { %669 = vrot.lane.b32.xlu1 %v624_v17, %s1660_s5  ;;  %v631_v54 = vrot.slane %v369_v26, 2  ;;  %v642_v55 = vsel %vm498_vm2, %v636_v42, %v641_v43  ;;  %v462_v56 = vsel %vm417_vm0, %v460_v45, %v461_v46  ;;  %vm675_vm3 = vcmask 261120  }
  0x56   :  { %490 = vrot.lane.b32.xlu0 %v456_v13, %s1658_s20  ;;  %v627_v58 = vor.u32 %v626_v52, %v625_v49  ;;  %vm708_vm4 = vcmask 523264   ;;  %vm741_vm5 = vcmask 785408   ;;  %vm1662_vm6 = vmmov 0  }
  0x57   :  { %v632_v59 = vor.u32 %v631_v54, %v630_v51  ;;  %vm1268_vm7 = vcmask 1041409   ;;  %vm1271_vm8 = vcmask 1042434   ;;  %vm1274_vm9 = vcmask 1043459  }
  0x58   :  { %vm1277_vm10 = vcmask 1044484   ;;  %vm1280_vm11 = vcmask 1045509   ;;  %vm1283_vm12 = vcmask 1046534   ;;  %vm1286_vm13 = vcmask 1047559  }
  0x59   :  { %415 = vrot.lane.b32.xlu1 %v384_v32, %s1659_s27  ;;  %v633_v60 = vsel %vm498_vm2, %v627_v58, %v632_v59 }
  0x5a   :  { %667 = vrot.lane.b32.xlu0 %v615_v37, %s1660_s5 }
  0x5d   :  { %496 = vrot.lane.b32.xlu1 %v465_v41, %s1658_s20 }
  0x5e   :  { %413 = vrot.lane.b32.xlu0 %v372_v50, %s1659_s27 }
  0x61   :  { %673 = vrot.lane.b32.xlu1 %v642_v55, %s1660_s5 }
  0x62   :  { %494 = vrot.lane.b32.xlu0 %v462_v56, %s1658_s20 }
  0x66   :  { %671 = vrot.lane.b32.xlu0 %v633_v60, %s1660_s5 }
  0x77   :  { %v467_v61 = vpop.permute.xlu1 %466 }
  0x7b   :  { %v469_v62 = vpop.permute.xlu1 %468 }
  0x7c   :  { %v386_v1 = vpop.permute.xlu0 %385 }
  0x7d   :  { %v677_v5 = vsel %vm675_vm3, %v1688_v0, %v386_v1 }
  0x7e   :  { %v710_v12 = vsel %vm708_vm4, %v677_v5, %v467_v61 }
  0x7f   :  { %v646_v2 = vpop.permute.xlu1 %645 }
  0x80   :  { %v388_v63 = vpop.permute.xlu0 %387 }
  0x81   :  { %v679_v6 = vsel %vm675_vm3, %v1697_v4, %v388_v63 }
  0x82   :  { %v712_v8 = vsel %vm708_vm4, %v679_v6, %v469_v62 }
  0x83   :  { %v392_v7 = vpop.permute.xlu1 %391  ;;  %v746_v13 = vsel %vm741_vm5, %v712_v8, %v646_v2 }
  0x84   :  { %v644_v10 = vpop.permute.xlu0 %643  ;;  %v683_v4 = vsel %vm675_vm3, %v1713_v24, %v392_v7 }
  0x85   :  { %v743_v14 = vsel %vm741_vm5, %v710_v12, %v644_v10 }
  0x86   :  { %1527 = vmatprep.mubr.bf16.mxu0 %v743_v14 }
  0x87   :  { %1528 = vmatmul.mubr.bf16.vlgmr.msra.gmra.mrb[0].mxu0 %v746_v13  ;;  %v473_v16 = vpop.permute.xlu1 %472 }
  0x88   :  { %v390_v17 = vpop.permute.xlu0 %389  ;;  %v716_v19 = vsel %vm708_vm4, %v683_v4, %v473_v16 }
  0x89   :  { %v681_v20 = vsel %vm675_vm3, %v1724_v33, %v390_v17 }
  0x8b   :  { %v650_v0 = vpop.permute.xlu1 %649 }
  0x8c   :  { %v471_v18 = vpop.permute.xlu0 %470  ;;  %v752_v28 = vsel %vm741_vm5, %v716_v19, %v650_v0 }
  0x8d   :  { %v714_v22 = vsel %vm708_vm4, %v681_v20, %v471_v18 }
  0x8f   :  { %v396_v21 = vpop.permute.xlu1 %395 }
  0x90   :  { %v648_v23 = vpop.permute.xlu0 %647  ;;  %v687_v24 = vsel %vm675_vm3, %v1737_v47, %v396_v21 }
  0x91   :  { %v749_v26 = vsel %vm741_vm5, %v714_v22, %v648_v23 }
  0x92   :  { %1531 = vmatprep.mubr.bf16.mxu0 %v749_v26 }
  0x93   :  { %1532 = vmatmul.mubr.bf16.gmra.mrb[4].mxu0 %v752_v28  ;;  %v477_v29 = vpop.permute.xlu1 %476 }
  0x94   :  { %v394_v30 = vpop.permute.xlu0 %393  ;;  %v720_v34 = vsel %vm708_vm4, %v687_v24, %v477_v29 }
  0x95   :  { %v685_v33 = vsel %vm675_vm3, %v1758_v15, %v394_v30 }
  0x97   :  { %v654_v31 = vpop.permute.xlu1 %653 }
  0x98   :  { %v475_v32 = vpop.permute.xlu0 %474  ;;  %v758_v40 = vsel %vm741_vm5, %v720_v34, %v654_v31 }
  0x99   :  { %v718_v37 = vsel %vm708_vm4, %v685_v33, %v475_v32 }
  0x9b   :  { %v400_v36 = vpop.permute.xlu1 %399 }
  0x9c   :  { %v652_v38 = vpop.permute.xlu0 %651  ;;  %v691_v47 = vsel %vm675_vm3, %v1770_v27, %v400_v36 }
  0x9d   :  { %v755_v39 = vsel %vm741_vm5, %v718_v37, %v652_v38  ;;  %v1661_v38 = vmov 0.0  }
  0x9e   :  { %1535 = vmatprep.mubr.bf16.mxu0 %v755_v39  ;;  %1559 = vmatprep.subr.bf16.mxu1 %v1661_v38  ;;  %v1628_v39 = vld [vmem:[%s2202_s1 + $0x50] sm:$0xff]  }
  0x9f   :  { %1536 = vmatmul.mubr.bf16.gmra.mrb[8].mxu0 %v758_v40  ;;  %v481_v41 = vpop.permute.xlu1 %480  ;;  %v1629_v40 = vld [vmem:[%s2202_s1 + $0x58] sm:$0xff]   ;;  %1575 = vmatprep.mubr.msk.bf16.mxu1 %vm1662_vm6, %v1661_v38 }
  0xa0   :  { %v398_v42 = vpop.permute.xlu0 %397  ;;  %v724_v46 = vsel %vm708_vm4, %v691_v47, %v481_v41  ;;  %v1630_v41 = vld [vmem:[%s2202_s1 + $0x60] sm:$0xff]   ;;  %v1633_v47 = vld [vmem:[%s2202_s1 + $0x78] sm:$0xff]  }
  0xa1   :  { %v689_v15 = vsel %vm675_vm3, %v1788_v48, %v398_v42  ;;  %v1631_v42 = vld [vmem:[%s2202_s1 + $0x68] sm:$0xff]  }
  0xa3   :  { %v658_v43 = vpop.permute.xlu1 %657 }
  0xa4   :  { %v479_v45 = vpop.permute.xlu0 %478  ;;  %v764_v54 = vsel %vm741_vm5, %v724_v46, %v658_v43  ;;  %v1632_v43 = vld [vmem:[%s2202_s1 + $0x70] sm:$0xff]   ;;  %v2107_v46 = vld [vmem:[%s2203_s2] sm:$0xff] }
  0xa5   :  { %v722_v50 = vsel %vm708_vm4, %v689_v15, %v479_v45  ;;  %v2112_v15 = vld [vmem:[%s2203_s2 + $0x8] sm:$0xff] }
  0xa7   :  { %v404_v49 = vpop.permute.xlu1 %403 }
  0xa8   :  { %v656_v52 = vpop.permute.xlu0 %655  ;;  %v695_v27 = vsel %vm675_vm3, %v1809_v9, %v404_v49 }
  0xa9   :  { %v761_v51 = vsel %vm741_vm5, %v722_v50, %v656_v52 }
  0xaa   :  { %1539 = vmatprep.mubr.bf16.mxu0 %v761_v51 }
  0xab   :  { %1540 = vmatmul.mubr.bf16.gmra.mrb[12].mxu0 %v764_v54  ;;  %v485_v55 = vpop.permute.xlu1 %484 }
  0xac   :  { %v402_v56 = vpop.permute.xlu0 %401  ;;  %v728_v60 = vsel %vm708_vm4, %v695_v27, %v485_v55 }
  0xad   :  { %v693_v48 = vsel %vm675_vm3, %v1826_v25, %v402_v56 }
  0xaf   :  { %v662_v58 = vpop.permute.xlu1 %661 }
  0xb0   :  { %v483_v59 = vpop.permute.xlu0 %482  ;;  %v770_v63 = vsel %vm741_vm5, %v728_v60, %v662_v58 }
  0xb1   :  { %v726_v62 = vsel %vm708_vm4, %v693_v48, %v483_v59 }
  0xb3   :  { %v408_v61 = vpop.permute.xlu1 %407 }
  0xb4   :  { %v660_v1 = vpop.permute.xlu0 %659  ;;  %v699_v9 = vsel %vm675_vm3, %v1849_v53, %v408_v61 }
  0xb5   :  { %v767_v2 = vsel %vm741_vm5, %v726_v62, %v660_v1 }
  0xb6   :  { %1543 = vmatprep.mubr.bf16.mxu0 %v767_v2 }
  0xb7   :  { %1544 = vmatmul.mubr.bf16.gmra.mrb[16].mxu0 %v770_v63  ;;  %v489_v5 = vpop.permute.xlu1 %488 }
  0xb8   :  { %v406_v6 = vpop.permute.xlu0 %405  ;;  %v732_v10 = vsel %vm708_vm4, %v699_v9, %v489_v5 }
  0xb9   :  { %v697_v25 = vsel %vm675_vm3, %v1874_v11, %v406_v6 }
  0xbb   :  { %v666_v7 = vpop.permute.xlu1 %665 }
  0xbc   :  { %v487_v8 = vpop.permute.xlu0 %486  ;;  %v776_v17 = vsel %vm741_vm5, %v732_v10, %v666_v7 }
  0xbd   :  { %v730_v14 = vsel %vm708_vm4, %v697_v25, %v487_v8 }
  0xbf   :  { %v412_v12 = vpop.permute.xlu1 %411 }
  0xc0   :  { %v664_v13 = vpop.permute.xlu0 %663  ;;  %v703_v53 = vsel %vm675_vm3, %v1909_v44, %v412_v12  ;;  %v2123_v12 = vld [vmem:[%s2203_s2 + $0x10] ss:$0 sm:$0xff] }
  0xc1   :  { %v773_v16 = vsel %vm741_vm5, %v730_v14, %v664_v13 }
  0xc2   :  { %1547 = vmatprep.mubr.bf16.mxu0 %v773_v16 }
  0xc3   :  { %1548 = vmatmul.mubr.bf16.gmra.mrb[20].mxu0 %v776_v17  ;;  %v493_v0 = vpop.permute.xlu1 %492 }
  0xc4   :  { %v410_v4 = vpop.permute.xlu0 %409  ;;  %v736_v20 = vsel %vm708_vm4, %v703_v53, %v493_v0 }
  0xc5   :  { %v701_v11 = vsel %vm675_vm3, %v1932_v3, %v410_v4 }
  0xc7   :  { %v670_v18 = vpop.permute.xlu1 %669 }
  0xc8   :  { %v491_v19 = vpop.permute.xlu0 %490  ;;  %v782_v28 = vsel %vm741_vm5, %v736_v20, %v670_v18 }
  0xc9   :  { %v734_v22 = vsel %vm708_vm4, %v701_v11, %v491_v19 }
  0xcb   :  { %v416_v21 = vpop.permute.xlu1 %415 }
  0xcc   :  { %v668_v23 = vpop.permute.xlu0 %667  ;;  %v707_v44 = vsel %vm675_vm3, %v1962_v35, %v416_v21  ;;  %v1626_v35 = vld [vmem:[%s2202_s1 + $0x40] sm:$0xff]  }
  0xcd   :  { %v779_v26 = vsel %vm741_vm5, %v734_v22, %v668_v23  ;;  %1560 = vmatpush3.bf16.msra.mxu1 %v1626_v35 }
  0xce   :  { %1551 = vmatprep.mubr.bf16.mxu0 %v779_v26  ;;  %1561 = vmatprep.subr.bf16.mxu1 %v1661_v38 }
  0xcf   :  { %1552 = vmatmul.mubr.bf16.gmra.mrb[24].mxu0 %v782_v28  ;;  %v497_v30 = vpop.permute.xlu1 %496 }
  0xd0   :  { %v414_v29 = vpop.permute.xlu0 %413  ;;  %v740_v24 = vsel %vm708_vm4, %v707_v44, %v497_v30 }
  0xd1   :  { %v705_v3 = vsel %vm675_vm3, %v1980_v57, %v414_v29  ;;  %v1627_v57 = vld [vmem:[%s2202_s1 + $0x48] sm:$0xff]  }
  0xd2   :  { %1562 = vmatpush3.bf16.msra.mxu1 %v1627_v57 }
  0xd3   :  { %v674_v32 = vpop.permute.xlu1 %673  ;;  %1563 = vmatprep.subr.bf16.mxu1 %v1661_v38 }
  0xd4   :  { %v495_v31 = vpop.permute.xlu0 %494  ;;  %v788_v37 = vsel %vm741_vm5, %v740_v24, %v674_v32 }
  0xd5   :  { %v738_v34 = vsel %vm708_vm4, %v705_v3, %v495_v31 }
  0xd6   :  { %1564 = vmatpush3.bf16.msra.mxu1 %v1628_v39 }
  0xd7   :  { %1565 = vmatprep.subr.bf16.mxu1 %v1661_v38 }
  0xd8   :  { %v672_v33 = vpop.permute.xlu0 %671 }
  0xd9   :  { %v785_v36 = vsel %vm741_vm5, %v738_v34, %v672_v33 }
  0xda   :  { %1555 = vmatprep.mubr.bf16.mxu0 %v785_v36  ;;  %1566 = vmatpush3.bf16.msra.mxu1 %v1629_v40 }
  0xdb   :  { %1556 = vmatmul.mubr.bf16.gmra.mrb[28].mxu0 %v788_v37  ;;  %1567 = vmatprep.subr.bf16.mxu1 %v1661_v38 }
  0xde   :  { %1568 = vmatpush3.bf16.msra.mxu1 %v1630_v41 }
  0xdf   :  { %1569 = vmatprep.subr.bf16.mxu1 %v1661_v38 }
  0xe2   :  { %1570 = vmatpush3.bf16.msra.mxu1 %v1631_v42 }
  0xe3   :  { %1571 = vmatprep.subr.bf16.mxu1 %v1661_v38 }
  0xe6   :  { %1572 = vmatpush3.bf16.msra.mxu1 %v1632_v43 }
  0xe7   :  { %1573 = vmatprep.subr.bf16.mxu1 %v1661_v38 }
  0xea   :  { %1574 = vmatpush3.bf16.msra.mxu1 %v1633_v47 }
 0x15a   :  { %v1529_v45 = vpop.f32.mrb[0].mxu0 }
 0x15b   :  { %v888_v49 = vpop.f32.mrb[1].mxu0  ;;  %v1019_v52 = vadd.f32 %v1529_v45, %v2107_v46 }
 0x15c   :  { %v1530_v50 = vpop.f32.mrb[2].mxu0  ;;  %v1017_v55 = vadd.f32 %v2107_v46, %v888_v49 }
 0x15d   :  { %v1020_v51 = vadd.f32 %v1530_v50, %v2112_v15  ;;  %v891_v54 = vpop.f32.mrb[3].mxu0 }
 0x15e   :  { %v1018_v56 = vadd.f32 %v2112_v15, %v891_v54 }
 0x15f   :  { %v1056_v58 = vmax.f32 %v1019_v52, %v1020_v51 }
 0x160   :  { %v1049_v27 = vmax.f32 %v1017_v55, %v1018_v56 }
 0x161   :  { %v1057_v59 = vrot.slane %v1056_v58, 4 }
 0x162   :  { %v1050_v60 = vrot.slane %v1049_v27, 4 }
 0x163   :  { %v1058_v48 = vmax.f32 %v1056_v58, %v1057_v59 }
 0x164   :  { %v1051_v61 = vmax.f32 %v1049_v27, %v1050_v60 }
 0x165   :  { %v1059_v62 = vrot.slane %v1058_v48, 2 }
 0x166   :  { %v1052_v1 = vrot.slane %v1051_v61, 2  ;;  %v1533_v2 = vpop.f32.mrb[4].mxu0 }
 0x167   :  { %v1060_v63 = vmax.f32 %v1058_v48, %v1059_v62  ;;  %v904_v5 = vpop.f32.mrb[5].mxu0  ;;  %v1023_v8 = vadd.f32 %v1533_v2, %v2107_v46 }
 0x168   :  { %v1053_v6 = vmax.f32 %v1051_v61, %v1052_v1  ;;  %v1534_v7 = vpop.f32.mrb[6].mxu0  ;;  %v1021_v13 = vadd.f32 %v2107_v46, %v904_v5 }
 0x169   :  { %v1061_v9 = vrot.slane %v1060_v63, 1  ;;  %v1024_v10 = vadd.f32 %v1534_v7, %v2112_v15  ;;  %v907_v25 = vpop.f32.mrb[7].mxu0 }
 0x16a   :  { %v1054_v14 = vrot.slane %v1053_v6, 1  ;;  %v1022_v16 = vadd.f32 %v2112_v15, %v907_v25 }
 0x16b   :  { %v1062_v17 = vmax.f32 %v1060_v63, %v1061_v9  ;;  %v1070_v0 = vmax.f32 %v1023_v8, %v1024_v10 }
 0x16c   :  { %v1055_v4 = vmax.f32 %v1053_v6, %v1054_v14  ;;  %v1063_v18 = vmax.f32 %v1021_v13, %v1022_v16 }
 0x16d   :  { %v1167_v53 = vadd.f32 %v2123_v12, %v1062_v17  ;;  %v1071_v19 = vrot.slane %v1070_v0, 4 }
 0x16e   :  { %v1166_v20 = vadd.f32 %v2123_v12, %v1055_v4  ;;  %v1064_v11 = vrot.slane %v1063_v18, 4 }
 0x16f   :  { %v1183_v21 = vmax.f32 %v1167_v53, 0.0  ;;  %v1072_v22 = vmax.f32 %v1070_v0, %v1071_v19 }
 0x170   :  { %v1182_v23 = vmax.f32 %v1166_v20, 0.0  ;;  %v1065_v26 = vmax.f32 %v1063_v18, %v1064_v11 }
 0x171   :  { %v1216_v28 = vpack.c.bf16 %v1183_v21, %v1183_v21  ;;  %v1073_v29 = vrot.slane %v1072_v22, 2 }
 0x172   :  { %v1215_v30 = vpack.c.bf16 %v1182_v23, %v1182_v23  ;;  %v1066_v44 = vrot.slane %v1065_v26, 2  ;;  %v1537_v31 = vpop.f32.mrb[8].mxu0 }
 0x173   :  { %v1252_v24 = vunpack.c.l.b16 %v1216_v28  ;;  %v1074_v3 = vmax.f32 %v1072_v22, %v1073_v29  ;;  %v920_v32 = vpop.f32.mrb[9].mxu0  ;;  %v1027_v38 = vadd.f32 %v1537_v31, %v2107_v46 }
 0x174   :  { %v1251_v34 = vunpack.c.l.b16 %v1215_v30  ;;  %v1067_v33 = vmax.f32 %v1065_v26, %v1066_v44  ;;  %v1538_v36 = vpop.f32.mrb[10].mxu0  ;;  %v1025_v41 = vadd.f32 %v2107_v46, %v920_v32 }
 0x175   :  { %v1267_v37 = vrot.slane %v1252_v24, 7  ;;  %v1075_v35 = vrot.slane %v1074_v3, 1  ;;  %v1028_v57 = vadd.f32 %v1538_v36, %v2112_v15  ;;  %v923_v39 = vpop.f32.mrb[11].mxu0 }
 0x176   :  { %v1068_v40 = vrot.slane %v1067_v33, 1  ;;  %v1026_v42 = vadd.f32 %v2112_v15, %v923_v39 }
 0x177   :  { %v1269_v43 = vsel %vm1268_vm7, %v1267_v37, %v1251_v34  ;;  %v1076_v47 = vmax.f32 %v1074_v3, %v1075_v35  ;;  %v1084_v45 = vmax.f32 %v1027_v38, %v1028_v57 }
 0x178   :  { %v1069_v49 = vmax.f32 %v1067_v33, %v1068_v40  ;;  %v1077_v50 = vmax.f32 %v1025_v41, %v1026_v42 }
 0x179   :  { %v1169_v52 = vadd.f32 %v2123_v12, %v1076_v47  ;;  %v1085_v51 = vrot.slane %v1084_v45, 4 }
 0x17a   :  { %v1168_v54 = vadd.f32 %v2123_v12, %v1069_v49  ;;  %v1078_v55 = vrot.slane %v1077_v50, 4 }
 0x17b   :  { %v1185_v56 = vmax.f32 %v1169_v52, 0.0  ;;  %v1086_v58 = vmax.f32 %v1084_v45, %v1085_v51 }
 0x17c   :  { %v1184_v27 = vmax.f32 %v1168_v54, 0.0  ;;  %v1079_v59 = vmax.f32 %v1077_v50, %v1078_v55 }
 0x17d   :  { %v1218_v60 = vpack.c.bf16 %v1185_v56, %v1185_v56  ;;  %v1087_v48 = vrot.slane %v1086_v58, 2 }
 0x17e   :  { %v1217_v61 = vpack.c.bf16 %v1184_v27, %v1184_v27  ;;  %v1080_v62 = vrot.slane %v1079_v59, 2  ;;  %v1541_v1 = vpop.f32.mrb[12].mxu0 }
 0x17f   :  { %v1254_v2 = vunpack.c.l.b16 %v1218_v60  ;;  %v1088_v63 = vmax.f32 %v1086_v58, %v1087_v48  ;;  %v936_v5 = vpop.f32.mrb[13].mxu0  ;;  %v1031_v10 = vadd.f32 %v1541_v1, %v2107_v46 }
 0x180   :  { %v1253_v6 = vunpack.c.l.b16 %v1217_v61  ;;  %v1081_v7 = vmax.f32 %v1079_v59, %v1080_v62  ;;  %v1542_v9 = vpop.f32.mrb[14].mxu0  ;;  %v1029_v17 = vadd.f32 %v2107_v46, %v936_v5 }
 0x181   :  { %v1089_v8 = vrot.slane %v1088_v63, 1  ;;  %v1032_v25 = vadd.f32 %v1542_v9, %v2112_v15  ;;  %v939_v14 = vpop.f32.mrb[15].mxu0  ;;  %v1273_v4 = vrot.slane %v1254_v2, 5 }
 0x182   :  { %v1270_v13 = vrot.slane %v1253_v6, 6  ;;  %v1082_v16 = vrot.slane %v1081_v7, 1  ;;  %v1030_v0 = vadd.f32 %v2112_v15, %v939_v14 }
 0x183   :  { %v1090_v18 = vmax.f32 %v1088_v63, %v1089_v8  ;;  %v1098_v53 = vmax.f32 %v1031_v10, %v1032_v25 }
 0x184   :  { %v1083_v19 = vmax.f32 %v1081_v7, %v1082_v16  ;;  %v1091_v20 = vmax.f32 %v1029_v17, %v1030_v0  ;;  %v1272_v11 = vsel %vm1271_vm8, %v1270_v13, %v1269_v43 }
 0x185   :  { %v1171_v21 = vadd.f32 %v2123_v12, %v1090_v18  ;;  %v1099_v22 = vrot.slane %v1098_v53, 4  ;;  %v1275_v23 = vsel %vm1274_vm9, %v1273_v4, %v1272_v11 }
 0x186   :  { %v1170_v26 = vadd.f32 %v2123_v12, %v1083_v19  ;;  %v1092_v28 = vrot.slane %v1091_v20, 4 }
 0x187   :  { %v1187_v29 = vmax.f32 %v1171_v21, 0.0  ;;  %v1100_v30 = vmax.f32 %v1098_v53, %v1099_v22 }
 0x188   :  { %v1186_v44 = vmax.f32 %v1170_v26, 0.0  ;;  %v1093_v31 = vmax.f32 %v1091_v20, %v1092_v28 }
 0x189   :  { %v1220_v24 = vpack.c.bf16 %v1187_v29, %v1187_v29  ;;  %v1101_v3 = vrot.slane %v1100_v30, 2 }
 0x18a   :  { %v1219_v32 = vpack.c.bf16 %v1186_v44, %v1186_v44  ;;  %v1094_v34 = vrot.slane %v1093_v31, 2  ;;  %v1545_v33 = vpop.f32.mrb[16].mxu0 }
 0x18b   :  { %v1256_v36 = vunpack.c.l.b16 %v1220_v24  ;;  %v1102_v37 = vmax.f32 %v1100_v30, %v1101_v3  ;;  %v952_v35 = vpop.f32.mrb[17].mxu0  ;;  %v1035_v41 = vadd.f32 %v1545_v33, %v2107_v46 }
 0x18c   :  { %v1255_v38 = vunpack.c.l.b16 %v1219_v32  ;;  %v1095_v57 = vmax.f32 %v1093_v31, %v1094_v34  ;;  %v1546_v39 = vpop.f32.mrb[18].mxu0  ;;  %v1033_v49 = vadd.f32 %v2107_v46, %v952_v35 }
 0x18d   :  { %v1103_v40 = vrot.slane %v1102_v37, 1  ;;  %v1036_v42 = vadd.f32 %v1546_v39, %v2112_v15  ;;  %v955_v43 = vpop.f32.mrb[19].mxu0  ;;  %v1279_v52 = vrot.slane %v1256_v36, 3 }
 0x18e   :  { %v1276_v47 = vrot.slane %v1255_v38, 4  ;;  %v1096_v45 = vrot.slane %v1095_v57, 1  ;;  %v1034_v50 = vadd.f32 %v2112_v15, %v955_v43 }
 0x18f   :  { %v1104_v51 = vmax.f32 %v1102_v37, %v1103_v40  ;;  %v1112_v54 = vmax.f32 %v1035_v41, %v1036_v42 }
 0x190   :  { %v1097_v55 = vmax.f32 %v1095_v57, %v1096_v45  ;;  %v1105_v56 = vmax.f32 %v1033_v49, %v1034_v50  ;;  %v1278_v58 = vsel %vm1277_vm10, %v1276_v47, %v1275_v23 }
 0x191   :  { %v1173_v27 = vadd.f32 %v2123_v12, %v1104_v51  ;;  %v1113_v59 = vrot.slane %v1112_v54, 4  ;;  %v1281_v60 = vsel %vm1280_vm11, %v1279_v52, %v1278_v58 }
 0x192   :  { %v1172_v48 = vadd.f32 %v2123_v12, %v1097_v55  ;;  %v1106_v61 = vrot.slane %v1105_v56, 4 }
 0x193   :  { %v1114_v62 = vmax.f32 %v1112_v54, %v1113_v59  ;;  %v1189_v1 = vmax.f32 %v1173_v27, 0.0 }
 0x194   :  { %v1188_v2 = vmax.f32 %v1172_v48, 0.0  ;;  %v1107_v63 = vmax.f32 %v1105_v56, %v1106_v61 }
 0x195   :  { %v1115_v5 = vrot.slane %v1114_v62, 2  ;;  %v1222_v6 = vpack.c.bf16 %v1189_v1, %v1189_v1 }
 0x196   :  { %v1221_v7 = vpack.c.bf16 %v1188_v2, %v1188_v2  ;;  %v1108_v9 = vrot.slane %v1107_v63, 2  ;;  %v1549_v8 = vpop.f32.mrb[20].mxu0 }
 0x197   :  { %v1116_v10 = vmax.f32 %v1114_v62, %v1115_v5  ;;  %v968_v25 = vpop.f32.mrb[21].mxu0  ;;  %v1258_v14 = vunpack.c.l.b16 %v1222_v6  ;;  %v1039_v4 = vadd.f32 %v1549_v8, %v2107_v46 }
 0x198   :  { %v1257_v13 = vunpack.c.l.b16 %v1221_v7  ;;  %v1109_v16 = vmax.f32 %v1107_v63, %v1108_v9  ;;  %v1550_v17 = vpop.f32.mrb[22].mxu0  ;;  %v1037_v20 = vadd.f32 %v2107_v46, %v968_v25 }
 0x199   :  { %v1117_v0 = vrot.slane %v1116_v10, 1  ;;  %v1040_v18 = vadd.f32 %v1550_v17, %v2112_v15  ;;  %v971_v53 = vpop.f32.mrb[23].mxu0  ;;  %v1285_v26 = vrot.slane %v1258_v14, 1 }
 0x19a   :  { %v1110_v19 = vrot.slane %v1109_v16, 1  ;;  %v1038_v11 = vadd.f32 %v2112_v15, %v971_v53  ;;  %v1282_v21 = vrot.slane %v1257_v13, 2 }
 0x19b   :  { %v1118_v22 = vmax.f32 %v1116_v10, %v1117_v0  ;;  %v1126_v23 = vmax.f32 %v1039_v4, %v1040_v18 }
 0x19c   :  { %v1111_v28 = vmax.f32 %v1109_v16, %v1110_v19  ;;  %v1119_v29 = vmax.f32 %v1037_v20, %v1038_v11  ;;  %v1284_v30 = vsel %vm1283_vm12, %v1282_v21, %v1281_v60 }
 0x19d   :  { %v1175_v44 = vadd.f32 %v2123_v12, %v1118_v22  ;;  %v1127_v31 = vrot.slane %v1126_v23, 4  ;;  %v2159_v24 = vsel %vm1286_vm13, %v1285_v26, %v1284_v30 }
 0x19e   :  { %v1174_v3 = vadd.f32 %v2123_v12, %v1111_v28  ;;  %v1120_v32 = vrot.slane %v1119_v29, 4 }
 0x19f   :  { %v1191_v34 = vmax.f32 %v1175_v44, 0.0  ;;  %v1128_v33 = vmax.f32 %v1126_v23, %v1127_v31 }
 0x1a0   :  { %v1190_v36 = vmax.f32 %v1174_v3, 0.0  ;;  %v1121_v37 = vmax.f32 %v1119_v29, %v1120_v32 }
 0x1a1   :  { %v1224_v35 = vpack.c.bf16 %v1191_v34, %v1191_v34  ;;  %v1129_v38 = vrot.slane %v1128_v33, 2 }
 0x1a2   :  { %v1223_v57 = vpack.c.bf16 %v1190_v36, %v1190_v36  ;;  %v1122_v39 = vrot.slane %v1121_v37, 2  ;;  %v1553_v40 = vpop.f32.mrb[24].mxu0 }
 0x1a3   :  { %v1260_v41 = vunpack.c.l.b16 %v1224_v35  ;;  %v1130_v42 = vmax.f32 %v1128_v33, %v1129_v38  ;;  %v984_v43 = vpop.f32.mrb[25].mxu0  ;;  %v1043_v51 = vadd.f32 %v1553_v40, %v2107_v46 }
 0x1a4   :  { %v1259_v47 = vunpack.c.l.b16 %v1223_v57  ;;  %v1123_v45 = vmax.f32 %v1121_v37, %v1122_v39  ;;  %v1554_v49 = vpop.f32.mrb[26].mxu0  ;;  %v1041_v58 = vadd.f32 %v2107_v46, %v984_v43 }
 0x1a5   :  { %v1288_v50 = vrot.slane %v1260_v41, 7  ;;  %v1131_v52 = vrot.slane %v1130_v42, 1  ;;  %v1044_v54 = vadd.f32 %v1554_v49, %v2112_v15  ;;  %v987_v55 = vpop.f32.mrb[27].mxu0 }
 0x1a6   :  { %v1124_v56 = vrot.slane %v1123_v45, 1  ;;  %v1042_v27 = vadd.f32 %v2112_v15, %v987_v55 }
 0x1a7   :  { %v1289_v59 = vsel %vm1268_vm7, %v1288_v50, %v1259_v47  ;;  %v1132_v60 = vmax.f32 %v1130_v42, %v1131_v52  ;;  %v1140_v48 = vmax.f32 %v1043_v51, %v1044_v54 }
 0x1a8   :  { %v1125_v61 = vmax.f32 %v1123_v45, %v1124_v56  ;;  %v1133_v62 = vmax.f32 %v1041_v58, %v1042_v27 }
 0x1a9   :  { %v1177_v1 = vadd.f32 %v2123_v12, %v1132_v60  ;;  %v1141_v2 = vrot.slane %v1140_v48, 4 }
 0x1aa   :  { %v1176_v63 = vadd.f32 %v2123_v12, %v1125_v61  ;;  %v1134_v5 = vrot.slane %v1133_v62, 4 }
 0x1ab   :  { %v1193_v6 = vmax.f32 %v1177_v1, 0.0  ;;  %v1142_v7 = vmax.f32 %v1140_v48, %v1141_v2 }
 0x1ac   :  { %v1192_v9 = vmax.f32 %v1176_v63, 0.0  ;;  %v1135_v8 = vmax.f32 %v1133_v62, %v1134_v5 }
 0x1ad   :  { %v1226_v10 = vpack.c.bf16 %v1193_v6, %v1193_v6  ;;  %v1143_v25 = vrot.slane %v1142_v7, 2 }
 0x1ae   :  { %v1225_v14 = vpack.c.bf16 %v1192_v9, %v1192_v9  ;;  %v1136_v13 = vrot.slane %v1135_v8, 2  ;;  %v1557_v16 = vpop.f32.mrb[28].mxu0 }
 0x1af   :  { %v1262_v17 = vunpack.c.l.b16 %v1226_v10  ;;  %v1144_v0 = vmax.f32 %v1142_v7, %v1143_v25  ;;  %v1000_v4 = vpop.f32.mrb[29].mxu0  ;;  %v1047_v11 = vadd.f32 %v1557_v16, %v2107_v46  ;;  %v1460_v25 = vld [vmem:[%s2203_s2 + $0x18] ss:$0 sm:$0xff] }
 0x1b0   :  { %v1261_v18 = vunpack.c.l.b16 %v1225_v14  ;;  %v1137_v53 = vmax.f32 %v1135_v8, %v1136_v13  ;;  %v1558_v19 = vpop.f32.mrb[30].mxu0  ;;  %v1045_v28 = vadd.f32 %v2107_v46, %v1000_v4 }
 0x1b1   :  { %v1145_v20 = vrot.slane %v1144_v0, 1  ;;  %v1048_v21 = vadd.f32 %v1558_v19, %v2112_v15  ;;  %v1003_v22 = vpop.f32.mrb[31].mxu0  ;;  %v1292_v30 = vrot.slane %v1262_v17, 5 }
 0x1b2   :  { %v1290_v23 = vrot.slane %v1261_v18, 6  ;;  %v1138_v26 = vrot.slane %v1137_v53, 1  ;;  %v1046_v29 = vadd.f32 %v2112_v15, %v1003_v22 }
 0x1b3   :  { %v1146_v44 = vmax.f32 %v1144_v0, %v1145_v20  ;;  %v1154_v31 = vmax.f32 %v1047_v11, %v1048_v21 }
 0x1b4   :  { %v1139_v3 = vmax.f32 %v1137_v53, %v1138_v26  ;;  %v1147_v32 = vmax.f32 %v1045_v28, %v1046_v29  ;;  %v1291_v34 = vsel %vm1271_vm8, %v1290_v23, %v1289_v59 }
 0x1b5   :  { %v1179_v33 = vadd.f32 %v2123_v12, %v1146_v44  ;;  %v1155_v36 = vrot.slane %v1154_v31, 4  ;;  %v1293_v37 = vsel %vm1274_vm9, %v1292_v30, %v1291_v34 }
 0x1b6   :  { %v1178_v35 = vadd.f32 %v2123_v12, %v1139_v3  ;;  %v1148_v38 = vrot.slane %v1147_v32, 4 }
 0x1b7   :  { %v1195_v57 = vmax.f32 %v1179_v33, 0.0  ;;  %v1156_v39 = vmax.f32 %v1154_v31, %v1155_v36 }
 0x1b8   :  { %v1194_v46 = vmax.f32 %v1178_v35, 0.0  ;;  %v1149_v40 = vmax.f32 %v1147_v32, %v1148_v38 }
 0x1b9   :  { %v1228_v15 = vpack.c.bf16 %v1195_v57, %v1195_v57  ;;  %v1157_v41 = vrot.slane %v1156_v39, 2 }
 0x1ba   :  { %v1227_v42 = vpack.c.bf16 %v1194_v46, %v1194_v46  ;;  %v1150_v43 = vrot.slane %v1149_v40, 2 }
 0x1bb   :  { %v1264_v47 = vunpack.c.l.b16 %v1228_v15  ;;  %v1158_v45 = vmax.f32 %v1156_v39, %v1157_v41 }
 0x1bc   :  { %v1263_v49 = vunpack.c.l.b16 %v1227_v42  ;;  %v1151_v50 = vmax.f32 %v1149_v40, %v1150_v43 }
 0x1bd   :  { %v1159_v52 = vrot.slane %v1158_v45, 1  ;;  %v1296_v55 = vrot.slane %v1264_v47, 3 }
 0x1be   :  { %v1294_v51 = vrot.slane %v1263_v49, 4  ;;  %v1152_v54 = vrot.slane %v1151_v50, 1 }
 0x1bf   :  { %v1160_v56 = vmax.f32 %v1158_v45, %v1159_v52 }
 0x1c0   :  { %v1153_v58 = vmax.f32 %v1151_v50, %v1152_v54  ;;  %v1295_v27 = vsel %vm1277_vm10, %v1294_v51, %v1293_v37 }
 0x1c1   :  { %v1181_v59 = vadd.f32 %v2123_v12, %v1160_v56  ;;  %v1297_v60 = vsel %vm1280_vm11, %v1296_v55, %v1295_v27 }
 0x1c2   :  { %v1180_v48 = vadd.f32 %v2123_v12, %v1153_v58 }
 0x1c3   :  { %v1197_v61 = vmax.f32 %v1181_v59, 0.0 }
 0x1c4   :  { %v1196_v62 = vmax.f32 %v1180_v48, 0.0 }
 0x1c5   :  { %v1230_v1 = vpack.c.bf16 %v1197_v61, %v1197_v61 }
 0x1c6   :  { %v1229_v2 = vpack.c.bf16 %v1196_v62, %v1196_v62 }
 0x1c7   :  { %v1266_v63 = vunpack.c.l.b16 %v1230_v1 }
 0x1c8   :  { %v1265_v5 = vunpack.c.l.b16 %v1229_v2 }
 0x1c9   :  { %v1300_v7 = vrot.slane %v1266_v63, 1 }
 0x1ca   :  { %v1298_v6 = vrot.slane %v1265_v5, 2 }
 0x1cc   :  { %v1299_v9 = vsel %vm1283_vm12, %v1298_v6, %v1297_v60 }
 0x1cd   :  { %v1301_v8 = vsel %vm1286_vm13, %v1300_v7, %v1299_v9 }
 0x1ce   :  { %v1302_v10 = vpack.c.b16 %v1301_v8, %v2159_v24 }
 0x1d0   :  { %1576 = vmatmul.mubr.bf16.vlgmr.msra.gmra.mrb[0].mxu1 %v1302_v10 }
 0x2a3   :  { %v1386_v12 = vpop.f32.mrb[0].mxu1 }
 0x2a4   :  { %v1577_v14 = vpop.f32.mrb[1].mxu1  ;;  %v1387_v16 = vadd.f32 %v1460_v25, %v1386_v12 }
 0x2a5   :  { %v1389_v13 = vpop.f32.mrb[2].mxu1 }
 0x2a6   :  { %v1390_v17 = vadd.f32 %v1460_v25, %v1389_v13  ;;  %v1578_v0 = vpop.f32.mrb[3].mxu1 }
 0x2a8   :  { %v1476_v4 = vpack.c.bf16 %v1390_v17, %v1387_v16 }
 0x2aa   :  { %1477 = vst [vmem:[#allocation2] sm:$0xff] %v1476_v4  }
 0x2ab   :  { %1645 = shalt.err (!%p1642_p4)
}
 0x2ac   :  { %s1646_s0 = scalar_lea.hbm %s2204_s3, 128 }
 0x2ad   :  { %p1647_p5 = scmp.ne.s32.totalorder %s2204_s3, %s1646_s0  ;;  %p1650_p6 = scmp.lt.u32.totalorder %s1646_s0, %s2204_s3 }
 0x2af   :  { %p1652_p7 = pnand %p1650_p6, %p1647_p5 }
 0x2b1   :  { %1655 = shalt.err (!%p1652_p7)
}
 0x2b2   :  { %s1664_s23 = smov 4  }
 0x2b3   :  { %1414 = dma.vmem_to_hbm [thread:$0]  %s1409_s17, 128, %s2204_s3, [#allocation3], %s1658_s20, %s1658_s20, %s1664_s23  }
 0x2b4   :  { %1656 = dma.done.wait [#allocation3], 128  }
 0x2b5   :  { %1657 = vsyncadd [#allocation3], 4294967168 }
 0x2b6   :  { %1418 = vsyncpa [#allocation3], 1 }

</bundles_post_ra>
